<compile_context>
chip_gen: v7x
topology: tpu7x:2x2x1
jax: 0.10.0
libtpu: 0.0.40
codegen_flags: <defaults>
</compile_context>

<pallas_src>
import functools
import math

import jax
import jax.numpy as jnp
from jax.experimental import pallas as pl
from jax.experimental.pallas import tpu as pltpu

_LANES = 128
_MAX_TILE_ROWS = 2048     # 2048 * 128 * 4B = 1 MiB per input block


def _dice_kernel(x_ref, t_ref, o_ref, acc_ref, *, epsilon):
    # x_ref, t_ref: (TILE_ROWS, 128) f32 blocks of the flattened logits / targets
    # o_ref:        (1, 1) SMEM scalar output (dice)
    # acc_ref:      (3,) SMEM running sums: [intersection, sum(sigmoid(x)), sum(t)]
    step = pl.program_id(0)

    @pl.when(step == 0)
    def _init():
        acc_ref[0] = jnp.float32(0.0)
        acc_ref[1] = jnp.float32(0.0)
        acc_ref[2] = jnp.float32(0.0)

    x = x_ref[...]
    t = t_ref[...]
    s = jax.nn.sigmoid(x)                       # EUP transcendental, f32
    acc_ref[0] += jnp.sum(s * t)                # intersection
    acc_ref[1] += jnp.sum(s)                    # sum(sigmoid(inputs))
    acc_ref[2] += jnp.sum(t)                    # sum(targets)

    @pl.when(step == pl.num_programs(0) - 1)
    def _finalize():
        intersection = acc_ref[0]
        union = acc_ref[1] + acc_ref[2]
        o_ref[0, 0] = (2.0 * intersection + epsilon) / (union + epsilon)


def dice_loss_v(inputs, targets, epsilon=1e-6, tile_rows=None):
    """DiceLoss_v.forward: sigmoid(inputs), flatten, return
    (2*sum(p*t) + eps) / (sum(p) + sum(t) + eps)."""
    assert inputs.shape == targets.shape
    n = math.prod(inputs.shape)

    x = inputs.reshape(-1).astype(jnp.float32)
    t = targets.reshape(-1).astype(jnp.float32)

    rows_needed = -(-n // _LANES)
    if tile_rows is None:
        if rows_needed > _MAX_TILE_ROWS:
            tile_rows = _MAX_TILE_ROWS
        else:
            tile_rows = max(8, -(-rows_needed // 8) * 8)   # (8,128)-aligned single tile
    per_tile = tile_rows * _LANES
    n_tiles = -(-n // per_tile)
    n_pad = n_tiles * per_tile

    # Pad so padded logits give sigmoid == 0 and padded targets == 0 (zero contribution).
    x = jnp.pad(x, (0, n_pad - n), constant_values=-1e30)
    t = jnp.pad(t, (0, n_pad - n), constant_values=0.0)
    x = x.reshape(n_tiles * tile_rows, _LANES)
    t = t.reshape(n_tiles * tile_rows, _LANES)

    dice = pl.pallas_call(
        functools.partial(_dice_kernel, epsilon=float(epsilon)),
        out_shape=jax.ShapeDtypeStruct((1, 1), jnp.float32),
        grid=(n_tiles,),
        in_specs=[
            pl.BlockSpec((tile_rows, _LANES), lambda i: (i, 0)),
            pl.BlockSpec((tile_rows, _LANES), lambda i: (i, 0)),
        ],
        out_specs=pl.BlockSpec((1, 1), lambda i: (0, 0),
                               memory_space=pltpu.MemorySpace.SMEM),
        scratch_shapes=[pltpu.SMEM((3,), jnp.float32)],
        compiler_params=pltpu.CompilerParams(
            dimension_semantics=("arbitrary",)),
    )(x, t)
    return dice[0, 0]


def _dice_ref(inputs, targets, epsilon=1e-6):
    p = jax.nn.sigmoid(inputs).reshape(-1).astype(jnp.float32)
    t = targets.reshape(-1).astype(jnp.float32)
    inter = jnp.sum(p * t)
    union = jnp.sum(p) + jnp.sum(t)
    return (2.0 * inter + epsilon) / (union + epsilon)


if __name__ == "__main__":
    key = jax.random.PRNGKey(0)
    k1, k2 = jax.random.split(key)

    B, C, H, W = 2, 4, 16, 16
    inputs = jax.random.normal(k1, (B, C, H, W), jnp.float32)               # logits
    targets = (jax.random.uniform(k2, (B, C, H, W)) > 0.5).astype(jnp.float32)

    dice_fn = jax.jit(dice_loss_v)
    out = dice_fn(inputs, targets)
    jax.block_until_ready(out)

    ref = _dice_ref(inputs, targets)
    assert abs(float(out) - float(ref)) < 1e-4, (float(out), float(ref))

    # Also exercise the multi-tile accumulator path (grid length > 1) on the same data.
    multi_fn = jax.jit(functools.partial(dice_loss_v, tile_rows=8))
    out2 = multi_fn(inputs, targets)
    jax.block_until_ready(out2)
    assert abs(float(out2) - float(ref)) < 1e-4, (float(out2), float(ref))

    print("KERNEL_OK")
</pallas_src>

<mosaic_0001>
module attributes {stable_mosaic.version = 11 : i64} {
  func.func @_dice_kernel(%arg0: i32, %arg1: memref<16x128xf32, #tpu.memory_space<vmem>>, %arg2: memref<16x128xf32, #tpu.memory_space<vmem>>, %arg3: memref<1x1xf32, #tpu.memory_space<smem>>, %arg4: memref<3xf32, #tpu.memory_space<smem>>) attributes {dimension_semantics = [#tpu.dimension_semantics<arbitrary>], iteration_bounds = array<i64: 1>, scalar_prefetch = 0 : i64, scratch_operands = 1 : i64, tpu.core_type = #tpu.core_type<tc>, window_params = [{transform_indices = @transform_0, window_bounds = array<i64: 16, 128>}, {transform_indices = @transform_1, window_bounds = array<i64: 16, 128>}, {transform_indices = @transform_2, window_bounds = array<i64: 1, 1>}]} {
    %c0_i32 = arith.constant 0 : i32
    %0 = arith.cmpi eq, %arg0, %c0_i32 : i32
    %1 = arith.extui %0 : i1 to i32
    %c0_i32_0 = arith.constant 0 : i32
    %2 = arith.cmpi ne, %1, %c0_i32_0 : i32
    scf.if %2 {
      %cst_13 = arith.constant 0.000000e+00 : f32
      %c0_14 = arith.constant 0 : index
      %35 = memref.load %arg4[%c0_14] : memref<3xf32, #tpu.memory_space<smem>>
      memref.store %cst_13, %arg4[%c0_14] : memref<3xf32, #tpu.memory_space<smem>>
      %cst_15 = arith.constant 0.000000e+00 : f32
      %c1_16 = arith.constant 1 : index
      %36 = memref.load %arg4[%c1_16] : memref<3xf32, #tpu.memory_space<smem>>
      memref.store %cst_15, %arg4[%c1_16] : memref<3xf32, #tpu.memory_space<smem>>
      %cst_17 = arith.constant 0.000000e+00 : f32
      %c2_18 = arith.constant 2 : index
      %37 = memref.load %arg4[%c2_18] : memref<3xf32, #tpu.memory_space<smem>>
      memref.store %cst_17, %arg4[%c2_18] : memref<3xf32, #tpu.memory_space<smem>>
    } else {
    }
    %c0 = arith.constant 0 : index
    %c0_1 = arith.constant 0 : index
    %3 = vector.load %arg1[%c0, %c0_1] : memref<16x128xf32, #tpu.memory_space<vmem>>, vector<16x128xf32>
    %c0_2 = arith.constant 0 : index
    %c0_3 = arith.constant 0 : index
    %4 = vector.load %arg2[%c0_2, %c0_3] : memref<16x128xf32, #tpu.memory_space<vmem>>, vector<16x128xf32>
    %5 = arith.negf %3 : vector<16x128xf32>
    %6 = math.exp %5 : vector<16x128xf32>
    %cst = arith.constant 1.000000e+00 : f32
    %7 = vector.broadcast %cst : f32 to vector<16x128xf32>
    %8 = arith.addf %7, %6 : vector<16x128xf32>
    %9 = arith.divf %7, %8 : vector<16x128xf32>
    %c0_4 = arith.constant 0 : index
    %10 = memref.load %arg4[%c0_4] : memref<3xf32, #tpu.memory_space<smem>>
    %11 = arith.mulf %9, %4 : vector<16x128xf32>
    %12 = vector.shape_cast %11 : vector<16x128xf32> to vector<1x16x128xf32>
    %cst_5 = arith.constant dense<0.000000e+00> : vector<1xf32>
    %13 = vector.multi_reduction <add>, %12, %cst_5 [1, 2] : vector<1x16x128xf32> to vector<1xf32>
    %14 = vector.shape_cast %13 : vector<1xf32> to vector<1x1x1xf32>
    %15 = vector.extract %14[0, 0, 0] : f32 from vector<1x1x1xf32>
    %16 = arith.addf %10, %15 : f32
    %c0_6 = arith.constant 0 : index
    %17 = memref.load %arg4[%c0_6] : memref<3xf32, #tpu.memory_space<smem>>
    memref.store %16, %arg4[%c0_6] : memref<3xf32, #tpu.memory_space<smem>>
    %c1 = arith.constant 1 : index
    %18 = memref.load %arg4[%c1] : memref<3xf32, #tpu.memory_space<smem>>
    %19 = vector.shape_cast %9 : vector<16x128xf32> to vector<1x16x128xf32>
    %cst_7 = arith.constant dense<0.000000e+00> : vector<1xf32>
    %20 = vector.multi_reduction <add>, %19, %cst_7 [1, 2] : vector<1x16x128xf32> to vector<1xf32>
    %21 = vector.shape_cast %20 : vector<1xf32> to vector<1x1x1xf32>
    %22 = vector.extract %21[0, 0, 0] : f32 from vector<1x1x1xf32>
    %23 = arith.addf %18, %22 : f32
    %c1_8 = arith.constant 1 : index
    %24 = memref.load %arg4[%c1_8] : memref<3xf32, #tpu.memory_space<smem>>
    memref.store %23, %arg4[%c1_8] : memref<3xf32, #tpu.memory_space<smem>>
    %c2 = arith.constant 2 : index
    %25 = memref.load %arg4[%c2] : memref<3xf32, #tpu.memory_space<smem>>
    %26 = vector.shape_cast %4 : vector<16x128xf32> to vector<1x16x128xf32>
    %cst_9 = arith.constant dense<0.000000e+00> : vector<1xf32>
    %27 = vector.multi_reduction <add>, %26, %cst_9 [1, 2] : vector<1x16x128xf32> to vector<1xf32>
    %28 = vector.shape_cast %27 : vector<1xf32> to vector<1x1x1xf32>
    %29 = vector.extract %28[0, 0, 0] : f32 from vector<1x1x1xf32>
    %30 = arith.addf %25, %29 : f32
    %c2_10 = arith.constant 2 : index
    %31 = memref.load %arg4[%c2_10] : memref<3xf32, #tpu.memory_space<smem>>
    memref.store %30, %arg4[%c2_10] : memref<3xf32, #tpu.memory_space<smem>>
    %c0_i32_11 = arith.constant 0 : i32
    %32 = arith.cmpi eq, %arg0, %c0_i32_11 : i32
    %33 = arith.extui %32 : i1 to i32
    %c0_i32_12 = arith.constant 0 : i32
    %34 = arith.cmpi ne, %33, %c0_i32_12 : i32
    scf.if %34 {
      %c0_13 = arith.constant 0 : index
      %35 = memref.load %arg4[%c0_13] : memref<3xf32, #tpu.memory_space<smem>>
      %c1_14 = arith.constant 1 : index
      %36 = memref.load %arg4[%c1_14] : memref<3xf32, #tpu.memory_space<smem>>
      %c2_15 = arith.constant 2 : index
      %37 = memref.load %arg4[%c2_15] : memref<3xf32, #tpu.memory_space<smem>>
      %38 = arith.addf %36, %37 : f32
      %cst_16 = arith.constant 2.000000e+00 : f32
      %39 = arith.mulf %cst_16, %35 : f32
      %cst_17 = arith.constant 9.99999997E-7 : f32
      %40 = arith.addf %39, %cst_17 : f32
      %cst_18 = arith.constant 9.99999997E-7 : f32
      %41 = arith.addf %38, %cst_18 : f32
      %42 = arith.divf %40, %41 : f32
      %c0_19 = arith.constant 0 : index
      %c0_20 = arith.constant 0 : index
      %43 = memref.load %arg3[%c0_19, %c0_20] : memref<1x1xf32, #tpu.memory_space<smem>>
      memref.store %42, %arg3[%c0_19, %c0_20] : memref<1x1xf32, #tpu.memory_space<smem>>
    } else {
    }
    return
  }
  func.func @transform_0(%arg0: i32) -> (i32, i32) {
    %c0_i32 = arith.constant 0 : i32
    %c0_i32_0 = arith.constant 0 : i32
    return %arg0, %c0_i32 : i32, i32
  }
  func.func @transform_1(%arg0: i32) -> (i32, i32) {
    %c0_i32 = arith.constant 0 : i32
    %c0_i32_0 = arith.constant 0 : i32
    return %arg0, %c0_i32 : i32, i32
  }
  func.func @transform_2(%arg0: i32) -> (i32, i32) {
    %c0_i32 = arith.constant 0 : i32
    %c0_i32_0 = arith.constant 0 : i32
    %c0_i32_1 = arith.constant 0 : i32
    return %c0_i32, %c0_i32_0 : i32, i32
  }
}

</mosaic_0001>

<bundles_post_ra>
// kernel: dice_loss_v.1
= control target key start
LH: loop header
LB: loop body
LE: loop exit
PB: predicated region body
PF: predicated region fallthrough
CT: control target
= control target key end

     0   :  { %s188_s0 = inlined_call_operand.vmem [shape: f32[16,128], index: 0, kind: input, shape index: {}]   ;;  %s189_s1 = inlined_call_operand.vmem [shape: f32[16,128], index: 1, kind: input, shape index: {}]   ;;  %s190_s2 = inlined_call_operand.hbm [shape: f32[1,1], index: 2, kind: output, shape index: {}]  }
   0x1   :  { %v24_v0 = vld [vmem:[%s189_s1] sm:$0xff]  ;;  %v25_v1 = vld [vmem:[%s189_s1 + $0x8] sm:$0xff] }
   0x2   :  { %v22_v2 = vld [vmem:[%s188_s0] sm:$0xff]  ;;  %v69_v3 = vadd.f32 %v25_v1, %v24_v0  ;;  %v23_v4 = vld [vmem:[%s188_s0 + $0x8] sm:$0xff] }
   0x3   :  { %v111_v5 = vmul.f32 -1.442695, %v22_v2 }
   0x4   :  { %7 = vsyncpa [#allocation4], 0  ;;  %v112_v6 = vmul.f32 -1.442695, %v23_v4  ;;  %70 = vadd.xlane.f32.xlu1 %v69_v3  ;;  %s136_s26 = scalar_lea.hbm %s190_s2, 16 }
   0x5   :  { %126 = vpow2.f32 %v111_v5  ;;  %p137_p0 = scmp.ne.s32.totalorder %s190_s2, %s136_s26  ;;  %p140_p1 = scmp.lt.u32.totalorder %s136_s26, %s190_s2 }
   0x6   :  { %128 = vpow2.f32 %v112_v6 }
   0x7   :  { %p142_p2 = pnand %p140_p1, %p137_p0 }
   0xf   :  { %v127_v7 = vpop.eup %126 }
  0x10   :  { %v129_v8 = vpop.eup %128  ;;  %v32_v9 = vadd.f32 1.0, %v127_v7 }
  0x11   :  { %v33_v10 = vadd.f32 1.0, %v129_v8 }
  0x12   :  { %130 = vrcp.f32 %v32_v9 }
  0x13   :  { %132 = vrcp.f32 %v33_v10 }
  0x1c   :  { %v131_v11 = vpop.eup %130 }
  0x1d   :  { %v133_v12 = vpop.eup %132  ;;  %v39_v13 = vmul.f32 %v131_v11, %v24_v0 }
  0x1e   :  { %v40_v14 = vmul.f32 %v133_v12, %v25_v1  ;;  %v55_v16 = vadd.f32 %v133_v12, %v131_v11 }
  0x20   :  { %v41_v15 = vadd.f32 %v40_v14, %v39_v13 }
  0x22   :  { %42 = vadd.xlane.f32.xlu0 %v41_v15 }
  0x26   :  { %56 = vadd.xlane.f32.xlu0 %v55_v16 }
  0x91   :  { %v71_v17 = vpop.xlane.xlu1 %70 }
  0x92   :  { %v72_v18 = vrot.slane %v71_v17, 4 }
  0x94   :  { %v73_v19 = vadd.f32 %v72_v18, %v71_v17 }
  0x96   :  { %v74_v23 = vrot.slane %v73_v19, 2 }
  0x98   :  { %v75_v29 = vadd.f32 %v74_v23, %v73_v19 }
  0x9a   :  { %v76_v34 = vrot.slane %v75_v29, 1 }
  0x9c   :  { %v77_v37 = vadd.f32 %v76_v34, %v75_v29 }
  0xaf   :  { %v43_v20 = vpop.xlane.xlu0 %42 }
  0xb0   :  { %v44_v21 = vrot.slane %v43_v20, 4 }
  0xb2   :  { %v45_v22 = vadd.f32 %v44_v21, %v43_v20 }
  0xb3   :  { %v57_v24 = vpop.xlane.xlu0 %56 }
  0xb4   :  { %v46_v25 = vrot.slane %v45_v22, 2  ;;  %v58_v26 = vrot.slane %v57_v24, 4 }
  0xb6   :  { %v59_v27 = vadd.f32 %v58_v26, %v57_v24  ;;  %v47_v28 = vadd.f32 %v46_v25, %v45_v22 }
  0xb8   :  { %v60_v30 = vrot.slane %v59_v27, 2  ;;  %v48_v31 = vrot.slane %v47_v28, 1 }
  0xba   :  { %v61_v32 = vadd.f32 %v60_v30, %v59_v27  ;;  %v49_v33 = vadd.f32 %v48_v31, %v47_v28 }
  0xbc   :  { %117 = vpush %v49_v33  ;;  %v62_v35 = vrot.slane %v61_v32, 1 }
  0xbe   :  { %v63_v36 = vadd.f32 %v62_v35, %v61_v32 }
  0xc0   :  { %119 = vpush %v63_v36 }
  0xc1   :  { %121 = vpush %v77_v37 }
  0xed   :  { %s118_s0 = spop %117 }
  0xee   :  { %s89_s20 = smul.f32 2.0, %s118_s0 }
  0xf0   :  { %s90_s21 = sadd.f32 1e-06, %s89_s20 }
  0xf1   :  { %s120_s1 = spop %119 }
  0xf2   :  { %s122_s17 = spop %121 }
  0xf3   :  { %s88_s18 = sadd.f32 %s122_s17, %s120_s1 }
  0xf5   :  { %s91_s19 = sadd.f32 1e-06, %s88_s18 }
  0xf7   :  { %v92_v38 = vstv %s91_s19 }
  0xf8   :  { %134 = vrcp.f32 %v92_v38 }
 0x102   :  { %v135_v39 = vpop.eup %134 }
 0x103   :  { %123 = vpush %v135_v39 }
 0x134   :  { %s124_s22 = spop %123 }
 0x135   :  { %s95_s23 = smul.f32 %s124_s22, %s90_s21 }
 0x137   :  { %97 = sst [smem:[#allocation3]] %s95_s23 }
 0x138   :  { %145 = shalt.err (!%p142_p2)
}
 0x139   :  { %s148_s3 = smov [#allocation3]  }
 0x13a   :  { %105 = dma.smem_to_hbm %s148_s3, 16, %s190_s2, [#allocation4]  }
 0x13b   :  { %146 = dma.done.wait [#allocation4], 16  }
 0x13c   :  { %147 = vsyncadd [#allocation4], 4294967280 }
 0x13d   :  { %109 = sfence }
 0x13e   :  { %110 = vsyncpa [#allocation4], 1 }

</bundles_post_ra>
